<compile_context>
chip_gen: v5e
topology: v5e:2x2
jax: 0.10.0
libtpu: 0.0.40
codegen_flags: <defaults>
</compile_context>

<pallas_src>
import functools

import jax
import jax.numpy as jnp
from jax.experimental import pallas as pl
from jax.experimental.pallas import tpu as pltpu


def _round_up(x, m):
    return ((x + m - 1) // m) * m


# ---------------------------------------------------------------------------
# Kernel 1: the recurrent decode loop.  grid=(T,) sequential; hidden state is
# carried in a VMEM scratch across grid steps; weights have constant index_maps
# (DMA'd once, VMEM-resident); the embedding row for step t is fetched by the
# pipeline through a data-dependent index_map on the scalar-prefetched tokens.
# ---------------------------------------------------------------------------
def _attn_decoder_step_kernel(
    tok_ref,          # (T,) int32 SMEM (scalar prefetch; consumed by index_maps)
    emb_ref,          # (1, 1, HP) bf16 : embedding row of token t
    hid0_ref,         # (1, HP)  f32
    enc_ref,          # (LP, HP) bf16
    w_attn_ref,       # (2*HP, LP) bf16  rows [:HP]=emb half, [HP:]=hidden half
    b_attn_ref,       # (1, LP)  f32 (-1e30 in padded lanes)
    w_comb_ref,       # (2*HP, HP) bf16  rows [:HP]=emb half, [HP:]=attn half
    b_comb_ref,       # (1, HP)  f32
    w_gx_ref,         # (HP, 3*HP) bf16  [w_ir | w_iz | w_in]
    w_gh_ref,         # (HP, 3*HP) bf16  [w_hr | w_hz | w_hn]
    b_gx_ref,         # (1, 3*HP) f32    [b_ir | b_iz | b_in]
    b_gh_ref,         # (1, 3*HP) f32    [b_hr | b_hz | b_hn]
    h_out_ref,        # (1, 1, HP) f32 : h_t            (per-row output)
    attw_out_ref,     # (1, 1, LP) f32 : attn weights_t (per-row output)
    h_scr,            # (1, HP) f32 scratch : recurrent hidden state
):
    f32, bf16 = jnp.float32, jnp.bfloat16
    t = pl.program_id(0)
    HP = h_scr.shape[1]

    # Initialize the recurrent state once.
    @pl.when(t == 0)
    def _():
        h_scr[...] = hid0_ref[...]

    # ---- embedding row (dropout = eval-mode identity) ------------------------
    emb = emb_ref[0]                                        # (1, HP) bf16
    hid_f32 = h_scr[...]                                    # (1, HP) f32
    hid = hid_f32.astype(bf16)

    # ---- attn_weights = softmax(Linear_{2H->L}(cat(emb, hid))) ---------------
    # split dot on statically-sliced weight halves: no lane-axis concat.
    scores = (jnp.dot(emb, w_attn_ref[:HP, :], preferred_element_type=f32)
              + jnp.dot(hid, w_attn_ref[HP:, :], preferred_element_type=f32)
              + b_attn_ref[...])                            # (1, LP) f32
    m = jnp.max(scores, axis=-1, keepdims=True)
    e = jnp.exp(scores - m)
    attw = e * pl.reciprocal(jnp.sum(e, axis=-1, keepdims=True), approx=True)

    # ---- attn_applied = attn_weights @ encoder_outputs -----------------------
    attn_applied = jnp.dot(attw.astype(bf16), enc_ref[...],
                           preferred_element_type=f32)      # (1, HP) f32

    # ---- x = relu(Linear_{2H->H}(cat(emb, attn_applied))) : split dot --------
    x = jnp.maximum(
        jnp.dot(emb, w_comb_ref[:HP, :], preferred_element_type=f32)
        + jnp.dot(attn_applied.astype(bf16), w_comb_ref[HP:, :],
                  preferred_element_type=f32)
        + b_comb_ref[...], 0.0)                             # (1, HP) f32

    # ---- GRU cell: two (1,HP)@(HP,3HP) dots, lane-aligned gate slices --------
    pre_x = (jnp.dot(x.astype(bf16), w_gx_ref[...], preferred_element_type=f32)
             + b_gx_ref[...])                               # (1, 3HP) f32
    pre_h = (jnp.dot(hid, w_gh_ref[...], preferred_element_type=f32)
             + b_gh_ref[...])                               # (1, 3HP) f32
    r = jax.nn.sigmoid(pre_x[:, 0:HP] + pre_h[:, 0:HP])
    z = jax.nn.sigmoid(pre_x[:, HP:2 * HP] + pre_h[:, HP:2 * HP])
    n = jnp.tanh(pre_x[:, 2 * HP:3 * HP] + r * pre_h[:, 2 * HP:3 * HP])
    h_new = (1.0 - z) * n + z * hid_f32                     # (1, HP) f32
    h_scr[...] = h_new

    # ---- per-step outputs (output projection deferred to kernel 2) -----------
    h_out_ref[0] = h_new
    attw_out_ref[0] = attw


# ---------------------------------------------------------------------------
# Kernel 2: deferred output projection + log_softmax for all T steps at once:
# one batched (TP, HP) @ (HP, VP) matmul instead of T tiny M=1 dots.
# ---------------------------------------------------------------------------
def _output_proj_kernel(h_ref, w_out_ref, b_out_ref, logp_ref):
    f32 = jnp.float32
    logits = (jnp.dot(h_ref[...].astype(jnp.bfloat16), w_out_ref[...],
                      preferred_element_type=f32)
              + b_out_ref[...])                             # (TP, VP) f32
    m = jnp.max(logits, axis=-1, keepdims=True)
    e = jnp.exp(logits - m)
    lse = jnp.log(jnp.sum(e, axis=-1, keepdims=True))
    logp_ref[...] = logits - m - lse


# ---------------------------------------------------------------------------
# Parameter packing: bf16 cast + zero-pad to lane-aligned shapes.
# Padded hidden lanes stay exactly zero through the recurrence (zero weight
# rows/cols + zero biases); padded softmax lanes get bias -1e30 so exp -> 0.
# ---------------------------------------------------------------------------
def _pack_params(params, HP, LP, VP):
    f32, bf16 = jnp.float32, jnp.bfloat16
    V, H = params["embedding"].shape
    NEG = -1e30

    def pad2(x, rows, cols, fill=0.0):
        return jnp.pad(x, ((0, rows - x.shape[0]), (0, cols - x.shape[1])),
                       constant_values=fill)

    emb = pad2(params["embedding"], V, HP).astype(bf16).reshape(V, 1, HP)
    w_attn = jnp.concatenate(
        [pad2(params["w_attn"][:H], HP, LP),
         pad2(params["w_attn"][H:], HP, LP)], axis=0).astype(bf16)
    b_attn = pad2(params["b_attn"], 1, LP, fill=NEG).astype(f32)
    w_comb = jnp.concatenate(
        [pad2(params["w_comb"][:H], HP, HP),
         pad2(params["w_comb"][H:], HP, HP)], axis=0).astype(bf16)
    b_comb = pad2(params["b_comb"], 1, HP).astype(f32)
    w_gx = jnp.concatenate([pad2(params["w_ir"], HP, HP),
                            pad2(params["w_iz"], HP, HP),
                            pad2(params["w_in"], HP, HP)], axis=1).astype(bf16)
    w_gh = jnp.concatenate([pad2(params["w_hr"], HP, HP),
                            pad2(params["w_hz"], HP, HP),
                            pad2(params["w_hn"], HP, HP)], axis=1).astype(bf16)
    b_gx = jnp.concatenate([pad2(params["b_ir"], 1, HP),
                            pad2(params["b_iz"], 1, HP),
                            pad2(params["b_in"], 1, HP)], axis=1).astype(f32)
    b_gh = jnp.concatenate([pad2(params["b_hr"], 1, HP),
                            pad2(params["b_hz"], 1, HP),
                            pad2(params["b_hn"], 1, HP)], axis=1).astype(f32)
    w_out = pad2(params["w_out"], HP, VP).astype(bf16)
    b_out = pad2(params["b_out"], 1, VP, fill=NEG).astype(f32)
    return dict(emb=emb, w_attn=w_attn, b_attn=b_attn, w_comb=w_comb,
                b_comb=b_comb, w_gx=w_gx, w_gh=w_gh, b_gx=b_gx, b_gh=b_gh,
                w_out=w_out, b_out=b_out)


def attn_decoder_decode(tokens, hidden, encoder_outputs, params):
    """Runs T teacher-forced AttnDecoderRNN steps with two Pallas kernels.

    Args:
      tokens: (T,) int32 input token indices (one per decode step).
      hidden: (1, 1, H) float32 initial hidden state.
      encoder_outputs: (L, H) float32.
      params: dict from init_params (raw per-matrix parameters).

    Returns:
      log_probs (T, V), final hidden (1, 1, H), attn_weights (T, L)
    """
    f32, bf16 = jnp.float32, jnp.bfloat16
    T = tokens.shape[0]
    H = hidden.shape[-1]
    L = encoder_outputs.shape[0]
    V = params["w_out"].shape[1]
    HP = _round_up(H, 128)
    LP = _round_up(L, 128)
    VP = _round_up(V, 128)
    TP = _round_up(T, 8)

    p = _pack_params(params, HP, LP, VP)
    hid0 = jnp.pad(hidden.reshape(1, H).astype(f32), ((0, 0), (0, HP - H)))
    enc = jnp.pad(encoder_outputs.astype(f32),
                  ((0, LP - L), (0, HP - H))).astype(bf16)

    # Constant index_maps -> weight blocks DMA'd once, VMEM-resident all steps.
    const2 = lambda shape: pl.BlockSpec(shape, lambda t, tok: (0, 0))

    grid_spec = pltpu.PrefetchScalarGridSpec(
        num_scalar_prefetch=1,
        grid=(T,),
        in_specs=[
            # Per-step embedding row gathered via data-dependent index_map on
            # the scalar-prefetched token ids (pipeline prefetches row t+1).
            pl.BlockSpec((1, 1, HP), lambda t, tok: (tok[t], 0, 0)),
            const2((1, HP)),                             # initial hidden
            const2((LP, HP)),                            # encoder outputs
            const2((2 * HP, LP)), const2((1, LP)),       # attn
            const2((2 * HP, HP)), const2((1, HP)),       # attn_combine
            const2((HP, 3 * HP)), const2((HP, 3 * HP)),  # GRU W_x, W_h
            const2((1, 3 * HP)), const2((1, 3 * HP)),    # GRU b_x, b_h
        ],
        out_specs=[
            pl.BlockSpec((1, 1, HP), lambda t, tok: (t, 0, 0)),   # h_t
            pl.BlockSpec((1, 1, LP), lambda t, tok: (t, 0, 0)),   # attn_w_t
        ],
        scratch_shapes=[pltpu.VMEM((1, HP), jnp.float32)],
    )

    h_all, attw_all = pl.pallas_call(
        _attn_decoder_step_kernel,
        out_shape=(jax.ShapeDtypeStruct((T, 1, HP), jnp.float32),
                   jax.ShapeDtypeStruct((T, 1, LP), jnp.float32)),
        grid_spec=grid_spec,
        compiler_params=pltpu.CompilerParams(
            dimension_semantics=("arbitrary",)),   # sequential recurrence
    )(tokens.astype(jnp.int32), p["emb"], hid0, enc,
      p["w_attn"], p["b_attn"], p["w_comb"], p["b_comb"],
      p["w_gx"], p["w_gh"], p["b_gx"], p["b_gh"])

    h_seq = h_all.reshape(T, HP)
    attn_weights = attw_all.reshape(T, LP)[:, :L]
    final_hidden = h_seq[T - 1, :H].reshape(1, 1, H)

    # Deferred output projection + log_softmax (single batched matmul).
    h_pad = jnp.pad(h_seq, ((0, TP - T), (0, 0)))
    logp = pl.pallas_call(
        _output_proj_kernel,
        out_shape=jax.ShapeDtypeStruct((TP, VP), jnp.float32),
        grid=(1,),
        in_specs=[pl.BlockSpec((TP, HP), lambda i: (0, 0)),
                  pl.BlockSpec((HP, VP), lambda i: (0, 0)),
                  pl.BlockSpec((1, VP), lambda i: (0, 0))],
        out_specs=pl.BlockSpec((TP, VP), lambda i: (0, 0)),
    )(h_pad, p["w_out"], p["b_out"])

    log_probs = logp[:T, :V]
    return log_probs, final_hidden, attn_weights


def attn_decoder_step(input_idx, hidden, encoder_outputs, params):
    """Single decode step matching AttnDecoderRNN.forward(input, hidden, enc)."""
    tokens = jnp.reshape(input_idx, (1,)).astype(jnp.int32)
    logp, h, attw = attn_decoder_decode(tokens, hidden, encoder_outputs, params)
    return logp, h, attw          # (1, V), (1, 1, H), (1, L)


def init_params(key, hidden_size, output_size, max_length):
    """Deterministic synthetic params (Linear weights pre-transposed)."""
    H, V, L = hidden_size, output_size, max_length
    ks = jax.random.split(key, 19)
    u = lambda k, shape, s: jax.random.uniform(
        k, shape, jnp.float32, minval=-s, maxval=s)
    s2 = 1.0 / jnp.sqrt(2.0 * H)   # Linear(2H, .) init scale
    s1 = 1.0 / jnp.sqrt(1.0 * H)   # Linear(H, .) / GRU init scale
    return {
        "embedding": jax.random.normal(ks[0], (V, H), jnp.float32),
        "w_attn": u(ks[1], (2 * H, L), s2), "b_attn": u(ks[2], (1, L), s2),
        "w_comb": u(ks[3], (2 * H, H), s2), "b_comb": u(ks[4], (1, H), s2),
        "w_out": u(ks[5], (H, V), s1), "b_out": u(ks[6], (1, V), s1),
        "w_ir": u(ks[7], (H, H), s1), "w_iz": u(ks[8], (H, H), s1),
        "w_in": u(ks[9], (H, H), s1),
        "w_hr": u(ks[10], (H, H), s1), "w_hz": u(ks[11], (H, H), s1),
        "w_hn": u(ks[12], (H, H), s1),
        "b_ir": u(ks[13], (1, H), s1), "b_iz": u(ks[14], (1, H), s1),
        "b_in": u(ks[15], (1, H), s1),
        "b_hr": u(ks[16], (1, H), s1), "b_hz": u(ks[17], (1, H), s1),
        "b_hn": u(ks[18], (1, H), s1),
    }


def _reference_decode(tokens, hidden, encoder_outputs, params):
    """Pure-JAX reference mirroring the kernel's bf16 math (unpadded)."""
    f32, bf16 = jnp.float32, jnp.bfloat16
    H = hidden.shape[-1]
    cast = lambda name: params[name].astype(bf16)
    emb_tab = cast("embedding")
    enc = encoder_outputs.astype(bf16)
    hid = hidden.reshape(1, H).astype(f32)
    logps, attws = [], []
    for t in range(int(tokens.shape[0])):
        emb = emb_tab[tokens[t]][None, :]
        hb = hid.astype(bf16)
        scores = (jnp.dot(emb, cast("w_attn")[:H], preferred_element_type=f32)
                  + jnp.dot(hb, cast("w_attn")[H:], preferred_element_type=f32)
                  + params["b_attn"])
        attw = jax.nn.softmax(scores, axis=-1)
        attn_applied = jnp.dot(attw.astype(bf16), enc, preferred_element_type=f32)
        x = jnp.maximum(
            jnp.dot(emb, cast("w_comb")[:H], preferred_element_type=f32)
            + jnp.dot(attn_applied.astype(bf16), cast("w_comb")[H:],
                      preferred_element_type=f32)
            + params["b_comb"], 0.0)
        xb = x.astype(bf16)
        r = jax.nn.sigmoid(
            jnp.dot(xb, cast("w_ir"), preferred_element_type=f32) + params["b_ir"]
            + jnp.dot(hb, cast("w_hr"), preferred_element_type=f32) + params["b_hr"])
        z = jax.nn.sigmoid(
            jnp.dot(xb, cast("w_iz"), preferred_element_type=f32) + params["b_iz"]
            + jnp.dot(hb, cast("w_hz"), preferred_element_type=f32) + params["b_hz"])
        n = jnp.tanh(
            jnp.dot(xb, cast("w_in"), preferred_element_type=f32) + params["b_in"]
            + r * (jnp.dot(hb, cast("w_hn"), preferred_element_type=f32)
                   + params["b_hn"]))
        hid = (1.0 - z) * n + z * hid
        logits = (jnp.dot(hid.astype(bf16), cast("w_out"),
                          preferred_element_type=f32) + params["b_out"])
        logps.append(jax.nn.log_softmax(logits, axis=-1))
        attws.append(attw)
    return (jnp.concatenate(logps, axis=0), hid.reshape(1, 1, H),
            jnp.concatenate(attws, axis=0))


if __name__ == "__main__":
    hidden_size = 32     # padded to 128 lanes inside the kernel
    output_size = 128    # vocab
    max_length = 128
    T = 8                # decode steps fused into one kernel launch

    key = jax.random.PRNGKey(0)
    pkey, hkey, ekey, tkey = jax.random.split(key, 4)

    params = init_params(pkey, hidden_size, output_size, max_length)
    hidden0 = jax.random.normal(hkey, (1, 1, hidden_size), jnp.float32)
    encoder_outputs = jax.random.normal(
        ekey, (max_length, hidden_size), jnp.float32)
    tokens = jax.random.randint(tkey, (T,), 0, output_size, dtype=jnp.int32)

    decode = jax.jit(attn_decoder_decode)
    log_probs, final_hidden, attn_weights = decode(
        tokens, hidden0, encoder_outputs, params)
    jax.block_until_ready((log_probs, final_hidden, attn_weights))

    # Shape checks.
    assert log_probs.shape == (T, output_size)
    assert final_hidden.shape == (1, 1, hidden_size)
    assert attn_weights.shape == (T, max_length)

    # Intrinsic sanity checks.
    assert bool(jnp.all(jnp.isfinite(log_probs)))
    assert bool(jnp.allclose(jnp.sum(attn_weights, axis=-1), 1.0, atol=1e-2))
    lse = jax.scipy.special.logsumexp(log_probs, axis=-1)
    assert bool(jnp.allclose(lse, 0.0, atol=1e-3))

    # Reference comparison (loose: approx reciprocal + bf16 accumulation order).
    r_logp, r_hid, r_attw = _reference_decode(
        tokens, hidden0, encoder_outputs, params)
    assert float(jnp.max(jnp.abs(log_probs - r_logp))) < 0.1
    assert float(jnp.max(jnp.abs(attn_weights - r_attw))) < 1e-2
    assert float(jnp.max(jnp.abs(final_hidden - r_hid))) < 1e-2

    # Single-step API matching the nn.Module.forward signature.
    step = jax.jit(functools.partial(attn_decoder_step, params=params))
    lp1, h1, aw1 = step(tokens[0], hidden0, encoder_outputs)
    jax.block_until_ready((lp1, h1, aw1))
    assert lp1.shape == (1, output_size)
    assert h1.shape == (1, 1, hidden_size)
    assert aw1.shape == (1, max_length)

    print("KERNEL_OK")
</pallas_src>

<mosaic_0001>
module attributes {stable_mosaic.version = 11 : i64} {
  func.func @_output_proj_kernel(%arg0: i32, %arg1: memref<8x128xf32, #tpu.memory_space<vmem>>, %arg2: memref<128x128xbf16, #tpu.memory_space<vmem>>, %arg3: memref<1x128xf32, #tpu.memory_space<vmem>>, %arg4: memref<8x128xf32, #tpu.memory_space<vmem>>) attributes {dimension_semantics = [#tpu.dimension_semantics<arbitrary>], iteration_bounds = array<i64: 1>, scalar_prefetch = 0 : i64, scratch_operands = 0 : i64, tpu.core_type = #tpu.core_type<tc>, window_params = [{pipeline_mode = #tpu.pipeline_mode<synchronous>, transform_indices = @transform_0, window_bounds = array<i64: 8, 128>}, {pipeline_mode = #tpu.pipeline_mode<synchronous>, transform_indices = @transform_1, window_bounds = array<i64: 128, 128>}, {pipeline_mode = #tpu.pipeline_mode<synchronous>, transform_indices = @transform_2, window_bounds = array<i64: 1, 128>}, {pipeline_mode = #tpu.pipeline_mode<synchronous>, transform_indices = @transform_3, window_bounds = array<i64: 8, 128>}]} {
    %c0 = arith.constant 0 : index
    %c0_0 = arith.constant 0 : index
    %0 = vector.load %arg1[%c0, %c0_0] : memref<8x128xf32, #tpu.memory_space<vmem>>, vector<8x128xf32>
    %1 = arith.truncf %0 : vector<8x128xf32> to vector<8x128xbf16>
    %c0_1 = arith.constant 0 : index
    %c0_2 = arith.constant 0 : index
    %2 = vector.load %arg2[%c0_1, %c0_2] : memref<128x128xbf16, #tpu.memory_space<vmem>>, vector<128x128xbf16>
    %cst = arith.constant dense<0.000000e+00> : vector<8x128xf32>
    %3 = tpu.matmul %1, %2, %cst {dimension_numbers = #tpu.dot_dimension_numbers<[1], [0], [0], [1], [0, 0, 1, 1], [], []>} : vector<8x128xbf16>, vector<128x128xbf16>, vector<8x128xf32> -> vector<8x128xf32>
    %c0_3 = arith.constant 0 : index
    %c0_4 = arith.constant 0 : index
    %4 = vector.load %arg3[%c0_3, %c0_4] : memref<1x128xf32, #tpu.memory_space<vmem>>, vector<1x128xf32>
    %5 = vector.broadcast %4 : vector<1x128xf32> to vector<8x128xf32>
    %6 = arith.addf %3, %5 : vector<8x128xf32>
    %cst_5 = arith.constant dense<0xFF800000> : vector<8xf32>
    %7 = vector.multi_reduction <maximumf>, %6, %cst_5 [1] : vector<8x128xf32> to vector<8xf32>
    %8 = vector.shape_cast %7 : vector<8xf32> to vector<8x1xf32>
    %9 = vector.broadcast %8 : vector<8x1xf32> to vector<8x128xf32>
    %10 = arith.subf %6, %9 : vector<8x128xf32>
    %11 = math.exp %10 : vector<8x128xf32>
    %cst_6 = arith.constant dense<0.000000e+00> : vector<8xf32>
    %12 = vector.multi_reduction <add>, %11, %cst_6 [1] : vector<8x128xf32> to vector<8xf32>
    %13 = vector.shape_cast %12 : vector<8xf32> to vector<8x1xf32>
    %14 = math.log %13 : vector<8x1xf32>
    %15 = vector.broadcast %8 : vector<8x1xf32> to vector<8x128xf32>
    %16 = arith.subf %6, %15 : vector<8x128xf32>
    %17 = vector.broadcast %14 : vector<8x1xf32> to vector<8x128xf32>
    %18 = arith.subf %16, %17 : vector<8x128xf32>
    %c0_7 = arith.constant 0 : index
    %c0_8 = arith.constant 0 : index
    %19 = vector.load %arg4[%c0_7, %c0_8] : memref<8x128xf32, #tpu.memory_space<vmem>>, vector<8x128xf32>
    tpu.vector_store %arg4[%c0_7, %c0_8], %18 {strides = array<i32>} : memref<8x128xf32, #tpu.memory_space<vmem>>, vector<8x128xf32>,
    return
  }
  func.func @transform_0(%arg0: i32) -> (i32, i32) {
    %c0_i32 = arith.constant 0 : i32
    %c0_i32_0 = arith.constant 0 : i32
    %c0_i32_1 = arith.constant 0 : i32
    return %c0_i32, %c0_i32_0 : i32, i32
  }
  func.func @transform_1(%arg0: i32) -> (i32, i32) {
    %c0_i32 = arith.constant 0 : i32
    %c0_i32_0 = arith.constant 0 : i32
    %c0_i32_1 = arith.constant 0 : i32
    return %c0_i32, %c0_i32_0 : i32, i32
  }
  func.func @transform_2(%arg0: i32) -> (i32, i32) {
    %c0_i32 = arith.constant 0 : i32
    %c0_i32_0 = arith.constant 0 : i32
    %c0_i32_1 = arith.constant 0 : i32
    return %c0_i32, %c0_i32_0 : i32, i32
  }
  func.func @transform_3(%arg0: i32) -> (i32, i32) {
    %c0_i32 = arith.constant 0 : i32
    %c0_i32_0 = arith.constant 0 : i32
    %c0_i32_1 = arith.constant 0 : i32
    return %c0_i32, %c0_i32_0 : i32, i32
  }
}

module attributes {stable_mosaic.version = 11 : i64} {
  func.func @_attn_decoder_step_kernel(%arg0: i32, %arg1: memref<8xi32, #tpu.memory_space<smem>>, %arg2: memref<1x1x128xbf16, #tpu.memory_space<vmem>>, %arg3: memref<1x128xf32, #tpu.memory_space<vmem>>, %arg4: memref<128x128xbf16, #tpu.memory_space<vmem>>, %arg5: memref<256x128xbf16, #tpu.memory_space<vmem>>, %arg6: memref<1x128xf32, #tpu.memory_space<vmem>>, %arg7: memref<256x128xbf16, #tpu.memory_space<vmem>>, %arg8: memref<1x128xf32, #tpu.memory_space<vmem>>, %arg9: memref<128x384xbf16, #tpu.memory_space<vmem>>, %arg10: memref<128x384xbf16, #tpu.memory_space<vmem>>, %arg11: memref<1x384xf32, #tpu.memory_space<vmem>>, %arg12: memref<1x384xf32, #tpu.memory_space<vmem>>, %arg13: memref<1x1x128xf32, #tpu.memory_space<vmem>>, %arg14: memref<1x1x128xf32, #tpu.memory_space<vmem>>, %arg15: memref<1x128xf32, #tpu.memory_space<vmem>>) attributes {dimension_semantics = [#tpu.dimension_semantics<arbitrary>], iteration_bounds = array<i64: 8>, scalar_prefetch = 1 : i64, scratch_operands = 1 : i64, tpu.core_type = #tpu.core_type<tc>, window_params = [{transform_indices = @transform_0, window_bounds = array<i64: 1, 1, 128>}, {pipeline_mode = #tpu.pipeline_mode<synchronous>, transform_indices = @transform_1, window_bounds = array<i64: 1, 128>}, {pipeline_mode = #tpu.pipeline_mode<synchronous>, transform_indices = @transform_2, window_bounds = array<i64: 128, 128>}, {pipeline_mode = #tpu.pipeline_mode<synchronous>, transform_indices = @transform_3, window_bounds = array<i64: 256, 128>}, {pipeline_mode = #tpu.pipeline_mode<synchronous>, transform_indices = @transform_4, window_bounds = array<i64: 1, 128>}, {pipeline_mode = #tpu.pipeline_mode<synchronous>, transform_indices = @transform_5, window_bounds = array<i64: 256, 128>}, {pipeline_mode = #tpu.pipeline_mode<synchronous>, transform_indices = @transform_6, window_bounds = array<i64: 1, 128>}, {pipeline_mode = #tpu.pipeline_mode<synchronous>, transform_indices = @transform_7, window_bounds = array<i64: 128, 384>}, {pipeline_mode = #tpu.pipeline_mode<synchronous>, transform_indices = @transform_8, window_bounds = array<i64: 128, 384>}, {pipeline_mode = #tpu.pipeline_mode<synchronous>, transform_indices = @transform_9, window_bounds = array<i64: 1, 384>}, {pipeline_mode = #tpu.pipeline_mode<synchronous>, transform_indices = @transform_10, window_bounds = array<i64: 1, 384>}, {transform_indices = @transform_11, window_bounds = array<i64: 1, 1, 128>}, {transform_indices = @transform_12, window_bounds = array<i64: 1, 1, 128>}]} {
    %c0_i32 = arith.constant 0 : i32
    %0 = arith.cmpi eq, %arg0, %c0_i32 : i32
    %1 = arith.extui %0 : i1 to i32
    %c0_i32_0 = arith.constant 0 : i32
    %2 = arith.cmpi ne, %1, %c0_i32_0 : i32
    scf.if %2 {
      %c0_46 = arith.constant 0 : index
      %c0_47 = arith.constant 0 : index
      %79 = vector.load %arg3[%c0_46, %c0_47] : memref<1x128xf32, #tpu.memory_space<vmem>>, vector<1x128xf32>
      %c0_48 = arith.constant 0 : index
      %c0_49 = arith.constant 0 : index
      %80 = vector.load %arg15[%c0_48, %c0_49] : memref<1x128xf32, #tpu.memory_space<vmem>>, vector<1x128xf32>
      tpu.vector_store %arg15[%c0_48, %c0_49], %79 {strides = array<i32>} : memref<1x128xf32, #tpu.memory_space<vmem>>, vector<1x128xf32>,
    } else {
    }
    %c0 = arith.constant 0 : index
    %c0_1 = arith.constant 0 : index
    %c0_2 = arith.constant 0 : index
    %3 = vector.load %arg2[%c0, %c0_1, %c0_2] : memref<1x1x128xbf16, #tpu.memory_space<vmem>>, vector<1x1x128xbf16>
    %4 = vector.shape_cast %3 : vector<1x1x128xbf16> to vector<1x128xbf16>
    %c0_3 = arith.constant 0 : index
    %c0_4 = arith.constant 0 : index
    %5 = vector.load %arg15[%c0_3, %c0_4] : memref<1x128xf32, #tpu.memory_space<vmem>>, vector<1x128xf32>
    %6 = arith.truncf %5 : vector<1x128xf32> to vector<1x128xbf16>
    %c0_5 = arith.constant 0 : index
    %c0_6 = arith.constant 0 : index
    %7 = vector.load %arg5[%c0_5, %c0_6] : memref<256x128xbf16, #tpu.memory_space<vmem>>, vector<128x128xbf16>
    %cst = arith.constant dense<0.000000e+00> : vector<1x128xf32>
    %8 = tpu.matmul %4, %7, %cst {dimension_numbers = #tpu.dot_dimension_numbers<[1], [0], [0], [1], [0, 0, 1, 1], [], []>} : vector<1x128xbf16>, vector<128x128xbf16>, vector<1x128xf32> -> vector<1x128xf32>
    %c128 = arith.constant 128 : index
    %c0_7 = arith.constant 0 : index
    %9 = vector.load %arg5[%c128, %c0_7] : memref<256x128xbf16, #tpu.memory_space<vmem>>, vector<128x128xbf16>
    %cst_8 = arith.constant dense<0.000000e+00> : vector<1x128xf32>
    %10 = tpu.matmul %6, %9, %cst_8 {dimension_numbers = #tpu.dot_dimension_numbers<[1], [0], [0], [1], [0, 0, 1, 1], [], []>} : vector<1x128xbf16>, vector<128x128xbf16>, vector<1x128xf32> -> vector<1x128xf32>
    %11 = arith.addf %8, %10 : vector<1x128xf32>
    %c0_9 = arith.constant 0 : index
    %c0_10 = arith.constant 0 : index
    %12 = vector.load %arg6[%c0_9, %c0_10] : memref<1x128xf32, #tpu.memory_space<vmem>>, vector<1x128xf32>
    %13 = arith.addf %11, %12 : vector<1x128xf32>
    %cst_11 = arith.constant dense<0xFF800000> : vector<1xf32>
    %14 = vector.multi_reduction <maximumf>, %13, %cst_11 [1] : vector<1x128xf32> to vector<1xf32>
    %15 = vector.shape_cast %14 : vector<1xf32> to vector<1x1xf32>
    %16 = vector.broadcast %15 : vector<1x1xf32> to vector<1x128xf32>
    %17 = arith.subf %13, %16 : vector<1x128xf32>
    %18 = math.exp %17 : vector<1x128xf32>
    %cst_12 = arith.constant dense<0.000000e+00> : vector<1xf32>
    %19 = vector.multi_reduction <add>, %18, %cst_12 [1] : vector<1x128xf32> to vector<1xf32>
    %20 = vector.shape_cast %19 : vector<1xf32> to vector<1x1xf32>
    %21 = tpu.reciprocal %20 {approx = true} : vector<1x1xf32> -> vector<1x1xf32>
    %22 = vector.broadcast %21 : vector<1x1xf32> to vector<1x128xf32>
    %23 = arith.mulf %18, %22 : vector<1x128xf32>
    %24 = arith.truncf %23 : vector<1x128xf32> to vector<1x128xbf16>
    %c0_13 = arith.constant 0 : index
    %c0_14 = arith.constant 0 : index
    %25 = vector.load %arg4[%c0_13, %c0_14] : memref<128x128xbf16, #tpu.memory_space<vmem>>, vector<128x128xbf16>
    %cst_15 = arith.constant dense<0.000000e+00> : vector<1x128xf32>
    %26 = tpu.matmul %24, %25, %cst_15 {dimension_numbers = #tpu.dot_dimension_numbers<[1], [0], [0], [1], [0, 0, 1, 1], [], []>} : vector<1x128xbf16>, vector<128x128xbf16>, vector<1x128xf32> -> vector<1x128xf32>
    %c0_16 = arith.constant 0 : index
    %c0_17 = arith.constant 0 : index
    %27 = vector.load %arg7[%c0_16, %c0_17] : memref<256x128xbf16, #tpu.memory_space<vmem>>, vector<128x128xbf16>
    %cst_18 = arith.constant dense<0.000000e+00> : vector<1x128xf32>
    %28 = tpu.matmul %4, %27, %cst_18 {dimension_numbers = #tpu.dot_dimension_numbers<[1], [0], [0], [1], [0, 0, 1, 1], [], []>} : vector<1x128xbf16>, vector<128x128xbf16>, vector<1x128xf32> -> vector<1x128xf32>
    %29 = arith.truncf %26 : vector<1x128xf32> to vector<1x128xbf16>
    %c128_19 = arith.constant 128 : index
    %c0_20 = arith.constant 0 : index
    %30 = vector.load %arg7[%c128_19, %c0_20] : memref<256x128xbf16, #tpu.memory_space<vmem>>, vector<128x128xbf16>
    %cst_21 = arith.constant dense<0.000000e+00> : vector<1x128xf32>
    %31 = tpu.matmul %29, %30, %cst_21 {dimension_numbers = #tpu.dot_dimension_numbers<[1], [0], [0], [1], [0, 0, 1, 1], [], []>} : vector<1x128xbf16>, vector<128x128xbf16>, vector<1x128xf32> -> vector<1x128xf32>
    %32 = arith.addf %28, %31 : vector<1x128xf32>
    %c0_22 = arith.constant 0 : index
    %c0_23 = arith.constant 0 : index
    %33 = vector.load %arg8[%c0_22, %c0_23] : memref<1x128xf32, #tpu.memory_space<vmem>>, vector<1x128xf32>
    %34 = arith.addf %32, %33 : vector<1x128xf32>
    %cst_24 = arith.constant 0.000000e+00 : f32
    %35 = vector.broadcast %cst_24 : f32 to vector<1x128xf32>
    %36 = arith.maximumf %34, %35 : vector<1x128xf32>
    %37 = arith.truncf %36 : vector<1x128xf32> to vector<1x128xbf16>
    %c0_25 = arith.constant 0 : index
    %c0_26 = arith.constant 0 : index
    %38 = vector.load %arg9[%c0_25, %c0_26] : memref<128x384xbf16, #tpu.memory_space<vmem>>, vector<128x384xbf16>
    %cst_27 = arith.constant dense<0.000000e+00> : vector<1x384xf32>
    %39 = tpu.matmul %37, %38, %cst_27 {dimension_numbers = #tpu.dot_dimension_numbers<[1], [0], [0], [1], [0, 0, 1, 1], [], []>} : vector<1x128xbf16>, vector<128x384xbf16>, vector<1x384xf32> -> vector<1x384xf32>
    %c0_28 = arith.constant 0 : index
    %c0_29 = arith.constant 0 : index
    %40 = vector.load %arg11[%c0_28, %c0_29] : memref<1x384xf32, #tpu.memory_space<vmem>>, vector<1x384xf32>
    %41 = arith.addf %39, %40 : vector<1x384xf32>
    %c0_30 = arith.constant 0 : index
    %c0_31 = arith.constant 0 : index
    %42 = vector.load %arg10[%c0_30, %c0_31] : memref<128x384xbf16, #tpu.memory_space<vmem>>, vector<128x384xbf16>
    %cst_32 = arith.constant dense<0.000000e+00> : vector<1x384xf32>
    %43 = tpu.matmul %6, %42, %cst_32 {dimension_numbers = #tpu.dot_dimension_numbers<[1], [0], [0], [1], [0, 0, 1, 1], [], []>} : vector<1x128xbf16>, vector<128x384xbf16>, vector<1x384xf32> -> vector<1x384xf32>
    %c0_33 = arith.constant 0 : index
    %c0_34 = arith.constant 0 : index
    %44 = vector.load %arg12[%c0_33, %c0_34] : memref<1x384xf32, #tpu.memory_space<vmem>>, vector<1x384xf32>
    %45 = arith.addf %43, %44 : vector<1x384xf32>
    %46 = vector.extract_strided_slice %41 {offsets = [0, 0], sizes = [1, 128], strides = [1, 1]} : vector<1x384xf32> to vector<1x128xf32>
    %47 = vector.extract_strided_slice %45 {offsets = [0, 0], sizes = [1, 128], strides = [1, 1]} : vector<1x384xf32> to vector<1x128xf32>
    %48 = arith.addf %46, %47 : vector<1x128xf32>
    %49 = arith.negf %48 : vector<1x128xf32>
    %50 = math.exp %49 : vector<1x128xf32>
    %cst_35 = arith.constant 1.000000e+00 : f32
    %51 = vector.broadcast %cst_35 : f32 to vector<1x128xf32>
    %52 = arith.addf %51, %50 : vector<1x128xf32>
    %53 = arith.divf %51, %52 : vector<1x128xf32>
    %54 = vector.extract_strided_slice %41 {offsets = [0, 128], sizes = [1, 128], strides = [1, 1]} : vector<1x384xf32> to vector<1x128xf32>
    %55 = vector.extract_strided_slice %45 {offsets = [0, 128], sizes = [1, 128], strides = [1, 1]} : vector<1x384xf32> to vector<1x128xf32>
    %56 = arith.addf %54, %55 : vector<1x128xf32>
    %57 = arith.negf %56 : vector<1x128xf32>
    %58 = math.exp %57 : vector<1x128xf32>
    %cst_36 = arith.constant 1.000000e+00 : f32
    %59 = vector.broadcast %cst_36 : f32 to vector<1x128xf32>
    %60 = arith.addf %59, %58 : vector<1x128xf32>
    %61 = arith.divf %59, %60 : vector<1x128xf32>
    %62 = vector.extract_strided_slice %41 {offsets = [0, 256], sizes = [1, 128], strides = [1, 1]} : vector<1x384xf32> to vector<1x128xf32>
    %63 = vector.extract_strided_slice %45 {offsets = [0, 256], sizes = [1, 128], strides = [1, 1]} : vector<1x384xf32> to vector<1x128xf32>
    %64 = arith.mulf %53, %63 : vector<1x128xf32>
    %65 = arith.addf %62, %64 : vector<1x128xf32>
    %66 = math.tanh %65 : vector<1x128xf32>
    %cst_37 = arith.constant 1.000000e+00 : f32
    %67 = vector.broadcast %cst_37 : f32 to vector<1x128xf32>
    %68 = arith.subf %67, %61 : vector<1x128xf32>
    %69 = arith.mulf %68, %66 : vector<1x128xf32>
    %70 = arith.mulf %61, %5 : vector<1x128xf32>
    %71 = arith.addf %69, %70 : vector<1x128xf32>
    %c0_38 = arith.constant 0 : index
    %c0_39 = arith.constant 0 : index
    %72 = vector.load %arg15[%c0_38, %c0_39] : memref<1x128xf32, #tpu.memory_space<vmem>>, vector<1x128xf32>
    tpu.vector_store %arg15[%c0_38, %c0_39], %71 {strides = array<i32>} : memref<1x128xf32, #tpu.memory_space<vmem>>, vector<1x128xf32>,
    %c0_40 = arith.constant 0 : index
    %c0_41 = arith.constant 0 : index
    %c0_42 = arith.constant 0 : index
    %73 = vector.load %arg13[%c0_40, %c0_41, %c0_42] : memref<1x1x128xf32, #tpu.memory_space<vmem>>, vector<1x1x128xf32>
    %74 = vector.shape_cast %73 : vector<1x1x128xf32> to vector<1x128xf32>
    %75 = vector.shape_cast %71 : vector<1x128xf32> to vector<1x1x128xf32>
    tpu.vector_store %arg13[%c0_40, %c0_41, %c0_42], %75 {strides = array<i32>} : memref<1x1x128xf32, #tpu.memory_space<vmem>>, vector<1x1x128xf32>,
    %c0_43 = arith.constant 0 : index
    %c0_44 = arith.constant 0 : index
    %c0_45 = arith.constant 0 : index
    %76 = vector.load %arg14[%c0_43, %c0_44, %c0_45] : memref<1x1x128xf32, #tpu.memory_space<vmem>>, vector<1x1x128xf32>
    %77 = vector.shape_cast %76 : vector<1x1x128xf32> to vector<1x128xf32>
    %78 = vector.shape_cast %23 : vector<1x128xf32> to vector<1x1x128xf32>
    tpu.vector_store %arg14[%c0_43, %c0_44, %c0_45], %78 {strides = array<i32>} : memref<1x1x128xf32, #tpu.memory_space<vmem>>, vector<1x1x128xf32>,
    return
  }
  func.func @transform_0(%arg0: i32, %arg1: memref<8xi32, #tpu.memory_space<smem>>) -> (i32, i32, i32) {
    %0 = arith.index_cast %arg0 : i32 to index
    %1 = memref.load %arg1[%0] : memref<8xi32, #tpu.memory_space<smem>>
    %c0_i32 = arith.constant 0 : i32
    %c0_i32_0 = arith.constant 0 : i32
    %c0_i32_1 = arith.constant 0 : i32
    return %1, %c0_i32, %c0_i32_0 : i32, i32, i32
  }
  func.func @transform_1(%arg0: i32, %arg1: memref<8xi32, #tpu.memory_space<smem>>) -> (i32, i32) {
    %c0_i32 = arith.constant 0 : i32
    %c0_i32_0 = arith.constant 0 : i32
    %c0_i32_1 = arith.constant 0 : i32
    return %c0_i32, %c0_i32_0 : i32, i32
  }
  func.func @transform_2(%arg0: i32, %arg1: memref<8xi32, #tpu.memory_space<smem>>) -> (i32, i32) {
    %c0_i32 = arith.constant 0 : i32
    %c0_i32_0 = arith.constant 0 : i32
    %c0_i32_1 = arith.constant 0 : i32
    return %c0_i32, %c0_i32_0 : i32, i32
  }
  func.func @transform_3(%arg0: i32, %arg1: memref<8xi32, #tpu.memory_space<smem>>) -> (i32, i32) {
    %c0_i32 = arith.constant 0 : i32
    %c0_i32_0 = arith.constant 0 : i32
    %c0_i32_1 = arith.constant 0 : i32
    return %c0_i32, %c0_i32_0 : i32, i32
  }
  func.func @transform_4(%arg0: i32, %arg1: memref<8xi32, #tpu.memory_space<smem>>) -> (i32, i32) {
    %c0_i32 = arith.constant 0 : i32
    %c0_i32_0 = arith.constant 0 : i32
    %c0_i32_1 = arith.constant 0 : i32
    return %c0_i32, %c0_i32_0 : i32, i32
  }
  func.func @transform_5(%arg0: i32, %arg1: memref<8xi32, #tpu.memory_space<smem>>) -> (i32, i32) {
    %c0_i32 = arith.constant 0 : i32
    %c0_i32_0 = arith.constant 0 : i32
    %c0_i32_1 = arith.constant 0 : i32
    return %c0_i32, %c0_i32_0 : i32, i32
  }
  func.func @transform_6(%arg0: i32, %arg1: memref<8xi32, #tpu.memory_space<smem>>) -> (i32, i32) {
    %c0_i32 = arith.constant 0 : i32
    %c0_i32_0 = arith.constant 0 : i32
    %c0_i32_1 = arith.constant 0 : i32
    return %c0_i32, %c0_i32_0 : i32, i32
  }
  func.func @transform_7(%arg0: i32, %arg1: memref<8xi32, #tpu.memory_space<smem>>) -> (i32, i32) {
    %c0_i32 = arith.constant 0 : i32
    %c0_i32_0 = arith.constant 0 : i32
    %c0_i32_1 = arith.constant 0 : i32
    return %c0_i32, %c0_i32_0 : i32, i32
  }
  func.func @transform_8(%arg0: i32, %arg1: memref<8xi32, #tpu.memory_space<smem>>) -> (i32, i32) {
    %c0_i32 = arith.constant 0 : i32
    %c0_i32_0 = arith.constant 0 : i32
    %c0_i32_1 = arith.constant 0 : i32
    return %c0_i32, %c0_i32_0 : i32, i32
  }
  func.func @transform_9(%arg0: i32, %arg1: memref<8xi32, #tpu.memory_space<smem>>) -> (i32, i32) {
    %c0_i32 = arith.constant 0 : i32
    %c0_i32_0 = arith.constant 0 : i32
    %c0_i32_1 = arith.constant 0 : i32
    return %c0_i32, %c0_i32_0 : i32, i32
  }
  func.func @transform_10(%arg0: i32, %arg1: memref<8xi32, #tpu.memory_space<smem>>) -> (i32, i32) {
    %c0_i32 = arith.constant 0 : i32
    %c0_i32_0 = arith.constant 0 : i32
    %c0_i32_1 = arith.constant 0 : i32
    return %c0_i32, %c0_i32_0 : i32, i32
  }
  func.func @transform_11(%arg0: i32, %arg1: memref<8xi32, #tpu.memory_space<smem>>) -> (i32, i32, i32) {
    %c0_i32 = arith.constant 0 : i32
    %c0_i32_0 = arith.constant 0 : i32
    %c0_i32_1 = arith.constant 0 : i32
    return %arg0, %c0_i32, %c0_i32_0 : i32, i32, i32
  }
  func.func @transform_12(%arg0: i32, %arg1: memref<8xi32, #tpu.memory_space<smem>>) -> (i32, i32, i32) {
    %c0_i32 = arith.constant 0 : i32
    %c0_i32_0 = arith.constant 0 : i32
    %c0_i32_1 = arith.constant 0 : i32
    return %arg0, %c0_i32, %c0_i32_0 : i32, i32, i32
  }
}

</mosaic_0001>

<bundles_post_ra>
// kernel: attn_decoder_decode.3
= control target key start
LH: loop header
LB: loop body
LE: loop exit
PB: predicated region body
PF: predicated region fallthrough
CT: control target
= control target key end

     0   :  { %s251_s0 = inlined_call_operand.vmem [shape: f32[8,128], index: 0, kind: input, shape index: {}]   ;;  %s252_s1 = inlined_call_operand.vmem [shape: bf16[128,128], index: 1, kind: input, shape index: {}]   ;;  %s253_s2 = inlined_call_operand.vmem [shape: f32[1,128], index: 2, kind: input, shape index: {}]   ;;  %s254_s3 = inlined_call_operand.hbm [shape: f32[8,128], index: 3, kind: output, shape index: {}]  }
   0x1   :  { %v164_v0 = vld [vmem:[%s252_s1 + $0x38] sm:$0xff]  ;;  %v163_v1 = vld [vmem:[%s252_s1 + $0x30] sm:$0xff] }
   0x2   :  { %85 = vmatpush.bf16.msra.mxu0 %v164_v0 }
   0x3   :  { %8 = vsyncpa [#allocation3], 0  ;;  %v162_v2 = vld [vmem:[%s252_s1 + $0x28] sm:$0xff]  ;;  %v161_v3 = vld [vmem:[%s252_s1 + $0x20] sm:$0xff]  ;;  %s116_s7 = sshll.u32 %s254_s3, 4  ;;  %s117_s7 = int_to_ptr.hbm [resolvable:$true] %s116_s7 }
   0x4   :  { %v160_v4 = vld [vmem:[%s252_s1 + $0x18] sm:$0xff]  ;;  %v159_v5 = vld [vmem:[%s252_s1 + $0x10] sm:$0xff]  ;;  %v158_v6 = vld [vmem:[%s252_s1 + $0x8] sm:$0xff] }
   0x5   :  { %v157_v7 = vld [vmem:[%s252_s1] sm:$0xff] }
   0x6   :  { %86 = vmatpush.bf16.msra.mxu0 %v163_v1  ;;  %v15_v8 = vld [vmem:[%s251_s0] sm:$0xff]  ;;  %s197_s0 = smov [#allocation2]  }
   0x7   :  { %v16_v9 = vpack.c.bf16 %v15_v8, %v15_v8  ;;  %v166_v10 = vld [vmem:[%s253_s2] ss:$0 sm:$0xff]  ;;  %s114_s1 = sshll.u32 %s197_s0, 4  ;;  %s115_s1 = int_to_ptr.vmem [resolvable:$true] %s114_s1 }
   0xa   :  { %87 = vmatpush.bf16.msra.mxu0 %v162_v2 }
   0xe   :  { %88 = vmatpush.bf16.msra.mxu0 %v161_v3 }
  0x12   :  { %89 = vmatpush.bf16.msra.mxu0 %v160_v4 }
  0x16   :  { %90 = vmatpush.bf16.msra.mxu0 %v159_v5 }
  0x1a   :  { %91 = vmatpush.bf16.msra.mxu0 %v158_v6 }
  0x1e   :  { %92 = vmatpush.bf16.msra.mxu0 %v157_v7 }
  0x21   :  { %93 = vmatmul.bf16.vlgmr.msra.gmra.mxu0 %v16_v9 }
  0x9e   :  { %v94_v11 = vpop.f32.mrf.mxu0 }
  0x9f   :  { %v95_v12 = vadd.f32 %v166_v10, %v94_v11 }
  0xa1   :  { %98 = vmax.xlane.f32.xlu0 %v95_v12 }
  0xa6   :  { %v96_v13 = vpop.f32.mrf.mxu0 }
 0x114   :  { %v99_v14 = vpop.xlane.xlu0 %98 }
 0x115   :  { %v100_v15 = vsub.f32 %v95_v12, %v99_v14 }
 0x117   :  { %v101_v16 = vmul.f32 1.442695, %v100_v15 }
 0x119   :  { %167 = vpow2.f32 %v101_v16 }
 0x11f   :  { %v168_v17 = vpop.eup %167 }
 0x120   :  { %103 = vadd.xlane.f32.xlu0 %v168_v17 }
 0x193   :  { %v104_v18 = vpop.xlane.xlu0 %103 }
 0x194   :  { %169 = vlog2.f32 %v104_v18 }
 0x19a   :  { %v170_v19 = vpop.eup %169 }
 0x19b   :  { %v106_v20 = vmul.f32 0.6931472, %v170_v19 }
 0x19d   :  { %v107_v21 = vsub.f32 %v100_v15, %v106_v20 }
 0x19f   :  { %108 = vst [vmem:[#allocation2] sm:$0xff] %v107_v21 }
 0x1a0   :  { %119 = dma.vmem_to_hbm [thread:$0]  %s115_s1, 128, %s117_s7, [#allocation3]  }
 0x1a1   :  { %195 = dma.done.wait [#allocation3], 128  }
 0x1a2   :  { %196 = vsyncadd [#allocation3], 4294967168 }
 0x1a3   :  { %124 = vsyncpa [#allocation3], 1 }

// kernel: attn_decoder_decode.2
= control target key start
LH: loop header
LB: loop body
LE: loop exit
PB: predicated region body
PF: predicated region fallthrough
CT: control target
= control target key end

     0   :  { %s1979_s28 = smov [#allocation4]   ;;  %s2610_s0 = inlined_call_operand.vmem [shape: s32[8], index: 0, kind: input, shape index: {}]   ;;  %s2611_s1 = inlined_call_operand.vmem [shape: bf16[128,1,128], index: 1, kind: input, shape index: {}]   ;;  %s2612_s2 = inlined_call_operand.vmem [shape: f32[1,128], index: 2, kind: input, shape index: {}]   ;;  %s2613_s3 = inlined_call_operand.vmem [shape: bf16[128,128], index: 3, kind: input, shape index: {}]   ;;  %s2614_s4 = inlined_call_operand.vmem [shape: bf16[256,128], index: 4, kind: input, shape index: {}]   ;;  %s2615_s5 = inlined_call_operand.vmem [shape: f32[1,128], index: 5, kind: input, shape index: {}]   ;;  %s2616_s6 = inlined_call_operand.vmem [shape: bf16[256,128], index: 6, kind: input, shape index: {}]   ;;  %s2617_s7 = inlined_call_operand.vmem [shape: f32[1,128], index: 7, kind: input, shape index: {}]   ;;  %s2618_s8 = inlined_call_operand.vmem [shape: bf16[128,384], index: 8, kind: input, shape index: {}]   ;;  %s2619_s9 = inlined_call_operand.vmem [shape: bf16[128,384], index: 9, kind: input, shape index: {}]   ;;  %s2620_s10 = inlined_call_operand.vmem [shape: f32[1,384], index: 10, kind: input, shape index: {}]   ;;  %s2621_s11 = inlined_call_operand.vmem [shape: f32[1,384], index: 11, kind: input, shape index: {}]   ;;  %s2622_s12 = inlined_call_operand.vmem [shape: f32[8,1,128], index: 12, kind: output, shape index: {0}]   ;;  %s2623_s13 = inlined_call_operand.hbm [shape: f32[8,1,128], index: 13, kind: output, shape index: {1}]  }
   0x1   :  { %2629 = sst [smem:[#allocation13_spill]] %s2611_s1  ;;  %s20_s27 = sshll.u32 %s2610_s0, 4  ;;  %s21_s27 = int_to_ptr.vmem [resolvable:$true] %s20_s27 }
   0x2   :  { %2630 = sst [smem:[#allocation14_spill]] %s2612_s2 }
   0x3   :  { %23 = dma.vmem_to_smem %s21_s27, 16, %s1979_s28, [#allocation3] }
   0x4   :  { %1957 = dma.done.wait [#allocation3], 16 }
   0x5   :  { %1958 = vsyncadd [#allocation3], 4294967280 }
   0x6   :  { %26 = sfence }
   0x7   :  { %27 = vsyncpa [#allocation6], 0 }
   0x8   :  { %29 = vsyncpa [#allocation6 + $0x1], 0  ;;  %s2053_s29 = smov 0   ;;  %s2055_s30 = smov 0  }
   0x9   :  { %s2057_s14 = smov 0   ;;  %s2059_s15 = smov 0  }
   0xa LB: > { %2631 = sst [smem:[#allocation9_spill]] %s1973_s14  ;;  %s2074_s0 = sadd.s32 4294967295, %s1977_s15   ;;  %s1977_s15 = sphi %s2059_s15, %s2644_s15   ;;  %s1973_s14 = sphi %s2057_s14, %s2646_s14   ;;  %s1969_s30 = sphi %s2055_s30, %s2648_s30   ;;  %s1965_s29 = sphi %s2053_s29, %s2647_s29  }
   0xb   : > { %s1398_s16 = sadd.s32 4294967294, %s1977_s15   ;;  %s2078_s17 = sadd.s32 1, %s1977_s15  }
   0xc   : > { %2632 = sst [smem:[#allocation10_spill]] %s2078_s17  ;;  %s306_s18 = sadd.s32 1, %s1973_s14 }
   0xd   : > { %s303_s19 = ssub.s32 %s1977_s15, %s2078_s17  ;;  %p316_p0 = scmp.ne.s32.totalorder %s1973_s14, %s1969_s30 }
   0xe   : > { %p304_p1 = scmp.eq.s32.totalorder %s303_s19, 0  ;;  %p317_p2 = scmp.eq.s32.totalorder %s2074_s0, 7 }
   0xf   : > { %p322_p3 = scmp.ne.s32.totalorder %s1969_s30, %s1965_s29  ;;  %p323_p4 = scmp.eq.s32.totalorder %s1398_s16, 7 }
  0x10   : > { %s2089_s20 = scalar_select %p304_p1, %s1973_s14, %s306_s18  }
  0x11   : > { %p2091_p5 = por %p317_p2, %p316_p0  ;;  %p2095_p6 = por %p323_p4, %p322_p3 }
  0x12   : > { %2633 = sst [smem:[#allocation11_spill]] %s2089_s20  ;;  %p1401_p7 = scmp.ge.s32.totalorder %s1977_s15, 1 }
  0x13   : > { %s2635_s22 = scalar_select %p2095_p6, 1, 0 }
  0x14   : > { %p379_p8 = scmp.lt.s32.totalorder %s1977_s15, 9 }
  0x15   : > { %2636 = sst [smem:[#allocation12_spill]] %s2635_s22 }
  0x16   : > { %p380_p9 = pnand %p1401_p7, %p379_p8 }
  0x17   : > { %s2628_s23 = sand.u32 (!%p380_p9), 1, %s1969_s30   ;;  %s422_s24 = sld [smem:[#allocation4 + %s2074_s0]] (!%p380_p9) }
  0x18   : > { %383 = sbr.rel (%p380_p9) target bundleno = 914 (0x392), region = 64  ;;  %p427_p10 = scmp.lt.s32.totalorder (!%p380_p9), %s2074_s0, 7 }
  0x19   : > { %s2119_s20 = scalar_lea.vmem (!%p380_p9), [#allocation5], %s2628_s23  ;;  %p1402_p12 = scmp.ne.s32.totalorder (!%p380_p9), %s2074_s0, 0 }
  0x1d   : > { %s2105_s25 = scalar_select %p427_p10, %s2074_s0, 7 }
  0x1e   : > { %p423_p11 = scmp.lt.s32.totalorder %s422_s24, 127  ;;  %433 = sbr.rel (%p1402_p12) target bundleno = 39 (0x27), region = 68 }
  0x1f   : > { %s2638_s2 = sld [smem:[#allocation14_spill]] (!%p1402_p12) }
  0x20   : > { %s2650_s24 = smov (!%p423_p11, %s422_s24), 127 }
  0x25   : > { %v434_v0 = vld [vmem:[%s2638_s2] sm:$0x1] }
  0x26   : > { %435 = vst [vmem:[#allocation2] sm:$0x1] %v434_v0 }
  0x27 PF: > { %v1774_v1 = vld [vmem:[%s2614_s4 + $0x78] sm:$0xff]  ;;  %v1773_v3 = vld [vmem:[%s2614_s4 + $0x70] sm:$0xff]  ;;  %v1772_v5 = vld [vmem:[%s2614_s4 + $0x68] sm:$0xff]  ;;  %s2639_s1 = sld [smem:[#allocation13_spill]]  ;;  %vm595_vm0 = vcmask 1040384   ;;  %s1325_s19 = sshll.u32 %s2119_s20, 4  ;;  %s1326_s19 = int_to_ptr.vmem [resolvable:$true] %s1325_s19 }
  0x28   : > { %v1766_v2 = vld [vmem:[%s2614_s4 + $0x38] sm:$0xff]  ;;  %519 = vmatpush.bf16.msra.mxu0 %v1774_v1  ;;  %v1765_v4 = vld [vmem:[%s2614_s4 + $0x30] sm:$0xff]  ;;  %v1764_v6 = vld [vmem:[%s2614_s4 + $0x28] sm:$0xff]  ;;  %s2641_s17 = sand.u32 1, %s1969_s30   ;;  %s1933_s18 = scalar_lea.hbm %s2623_s13, 8 }
  0x29   : > { %580 = vmatpush.bf16.msra.mxu1 %v1766_v2  ;;  %v1771_v7 = vld [vmem:[%s2614_s4 + $0x60] sm:$0xff]  ;;  %v1770_v9 = vld [vmem:[%s2614_s4 + $0x58] sm:$0xff]  ;;  %v1769_v11 = vld [vmem:[%s2614_s4 + $0x50] sm:$0xff]  ;;  %s1312_s26 = scalar_lea.sflag [#allocation6], %s2641_s17 }
  0x2a   : > { %v1763_v8 = vld [vmem:[%s2614_s4 + $0x20] sm:$0xff]  ;;  %v1762_v10 = vld [vmem:[%s2614_s4 + $0x18] sm:$0xff]  ;;  %v1761_v12 = vld [vmem:[%s2614_s4 + $0x10] sm:$0xff] }
  0x2b   : > { %v1768_v13 = vld [vmem:[%s2614_s4 + $0x48] sm:$0xff]  ;;  %v1767_v15 = vld [vmem:[%s2614_s4 + $0x40] sm:$0xff]  ;;  %v1782_v28 = vld [vmem:[%s2613_s3 + $0x38] sm:$0xff] }
  0x2c   : > { %520 = vmatpush.bf16.msra.mxu0 %v1773_v3  ;;  %v1760_v14 = vld [vmem:[%s2614_s4 + $0x8] sm:$0xff]  ;;  %v1759_v16 = vld [vmem:[%s2614_s4] sm:$0xff]  ;;  %672 = vmatpush.bf16.msra.mxu2 %v1782_v28  ;;  %v1781_v29 = vld [vmem:[%s2613_s3 + $0x30] sm:$0xff] }
  0x2d   : > { %581 = vmatpush.bf16.msra.mxu1 %v1765_v4  ;;  %v2173_v17 = vld [vmem:[#allocation2] sm:$0x1]  ;;  %s2640_s16 = scalar_lea.vmem %s2639_s1, %s2650_s24  ;;  %v1780_v30 = vld [vmem:[%s2613_s3 + $0x28] sm:$0xff]  ;;  %v1778_v32 = vld [vmem:[%s2613_s3 + $0x18] sm:$0xff]  ;;  %s1323_s24 = scalar_lea.hbm %s2623_s13, %s2074_s0 }
  0x2e   : > { %v2177_v18 = vpack.c.bf16 %v2173_v17, %v2173_v17  ;;  %v2184_v19 = vld [vmem:[%s2640_s16] sm:$0x1]  ;;  %v1777_v38 = vld [vmem:[%s2613_s3 + $0x10] sm:$0xff]  ;;  %v1776_v39 = vld [vmem:[%s2613_s3 + $0x8] sm:$0xff]  ;;  %s1327_s14 = sshll.u32 %s1323_s24, 4  ;;  %s1328_s14 = int_to_ptr.hbm [resolvable:$true] %s1327_s14 }
  0x2f   : > { %v593_v22 = vld [vmem:[%s2615_s5] sm:$0x1]  ;;  %v1790_v41 = vld [vmem:[%s2616_s6 + $0x38] sm:$0xff]  ;;  %v1789_v43 = vld [vmem:[%s2616_s6 + $0x30] sm:$0xff]  ;;  %s1927_s27 = sshra.s32 %s1328_s14, 4  ;;  %s1928_s27 = int_to_ptr.hbm [resolvable:$true] %s1927_s27 }
  0x30   : > { %521 = vmatpush.bf16.msra.mxu0 %v1772_v5  ;;  %673 = vmatpush.bf16.msra.mxu2 %v1781_v29  ;;  %v1779_v31 = vld [vmem:[%s2613_s3 + $0x20] sm:$0xff]  ;;  %v1798_v42 = vld [vmem:[%s2616_s6 + $0x78] sm:$0xff]  ;;  %v1797_v44 = vld [vmem:[%s2616_s6 + $0x70] sm:$0xff]  ;;  %s1929_s22 = scalar_lea.hbm %s1928_s27, 1  ;;  %p1934_p2 = scmp.lt.s32.totalorder %s1928_s27, %s2623_s13 }
  0x31   : > { %582 = vmatpush.bf16.msra.mxu1 %v1764_v6  ;;  %v1775_v40 = vld [vmem:[%s2613_s3] sm:$0xff]  ;;  %766 = vmatpush.bf16.msra.mxu3 %v1798_v42  ;;  %v1788_v45 = vld [vmem:[%s2616_s6 + $0x28] sm:$0xff]  ;;  %v1786_v49 = vld [vmem:[%s2616_s6 + $0x18] sm:$0xff]  ;;  %p1930_p13 = scmp.ne.s32.totalorder %s1928_s27, %s1929_s22  ;;  %p1935_p3 = scmp.lt.s32.totalorder %s1933_s18, %s1929_s22 }
  0x32   : > { %v1796_v46 = vld [vmem:[%s2616_s6 + $0x68] sm:$0xff]  ;;  %v1787_v47 = vld [vmem:[%s2616_s6 + $0x20] sm:$0xff]  ;;  %v1794_v50 = vld [vmem:[%s2616_s6 + $0x58] sm:$0xff] }
  0x33   : > { %v1795_v48 = vld [vmem:[%s2616_s6 + $0x60] sm:$0xff]  ;;  %v1785_v51 = vld [vmem:[%s2616_s6 + $0x10] sm:$0xff]  ;;  %v1784_v54 = vld [vmem:[%s2616_s6 + $0x8] sm:$0xff]  ;;  %p1931_p0 = pnand %p1930_p13, %p2091_p5  ;;  %p1936_p4 = por %p1935_p3, %p1934_p2 }
  0x34   : > { %522 = vmatpush.bf16.msra.mxu0 %v1771_v7  ;;  %674 = vmatpush.bf16.msra.mxu2 %v1780_v30  ;;  %v1793_v52 = vld [vmem:[%s2616_s6 + $0x50] sm:$0xff]  ;;  %v1792_v55 = vld [vmem:[%s2616_s6 + $0x48] sm:$0xff]  ;;  %v1783_v56 = vld [vmem:[%s2616_s6] sm:$0xff] }
  0x35   : > { %583 = vmatpush.bf16.msra.mxu1 %v1763_v8  ;;  %767 = vmatpush.bf16.msra.mxu3 %v1797_v44  ;;  %v1791_v60 = vld [vmem:[%s2616_s6 + $0x40] sm:$0xff]  ;;  %v1649_v61 = vld [vmem:[%s2618_s8 + $0xa8] sm:$0xf]  ;;  %v1821_v62 = vld [vmem:[%s2618_s8 + $0xb0] sm:$0xf0]  ;;  %p1932_p1 = pneg %p1931_p0 }
  0x36   : > { %v1637_v63 = vld [vmem:[%s2618_s8 + $0x90] sm:$0xf]  ;;  %v1650_v0 = vor.u32 %v1821_v62, %v1649_v61  ;;  %v1818_v1 = vld [vmem:[%s2618_s8 + $0x98] sm:$0xf0]  ;;  %v1820_v2 = vld [vmem:[%s2618_s8 + $0xac] sm:$0xf] }
  0x37   : > { %v1651_v3 = vld [vmem:[%s2618_s8 + $0xb4] sm:$0xf0]  ;;  %v1817_v5 = vld [vmem:[%s2618_s8 + $0x94] sm:$0xf]  ;;  %v1638_v6 = vor.u32 %v1818_v1, %v1637_v63  ;;  %v1815_v8 = vld [vmem:[%s2618_s8 + $0x80] sm:$0xf0]  ;;  %p1937_p7 = pnand %p1936_p4, %p1932_p1 }
  0x38   : > { %523 = vmatpush.bf16.msra.mxu0 %v1770_v9  ;;  %675 = vmatpush.bf16.msra.mxu2 %v1779_v31  ;;  %v1654_v4 = vor.u32 %v1820_v2, %v1651_v3  ;;  %v1625_v7 = vld [vmem:[%s2618_s8 + $0x78] sm:$0xf]  ;;  %v1639_v9 = vld [vmem:[%s2618_s8 + $0x9c] sm:$0xf0]  ;;  %v1811_v31 = vld [vmem:[%s2618_s8 + $0x64] sm:$0xf] }
  0x39   : > { %584 = vmatpush.bf16.msra.mxu1 %v1762_v10  ;;  %768 = vmatpush.bf16.msra.mxu3 %v1796_v46  ;;  %v1642_v10 = vor.u32 %v1817_v5, %v1639_v9  ;;  %v1709_v44 = vld [vmem:[%s2619_s9 + $0x60] sm:$0xf]  ;;  %v1603_v46 = vld [vmem:[%s2618_s8 + $0x54] sm:$0xf0]  ;;  %v1803_v1 = vld [vmem:[%s2618_s8 + $0x20] sm:$0xf0] }
  0x3a   : > { %v1579_v5 = vld [vmem:[%s2618_s8 + $0x24] sm:$0xf0]  ;;  %v1807_v9 = vld [vmem:[%s2618_s8 + $0x40] sm:$0xf0] }
  0x3c   : > { %524 = vmatpush.bf16.msra.mxu0 %v1769_v11  ;;  %676 = vmatpush.bf16.msra.mxu2 %v1778_v32  ;;  %v1745_v11 = vld [vmem:[%s2619_s9 + $0xa8] sm:$0xf]  ;;  %v1615_v32 = vld [vmem:[%s2618_s8 + $0x6c] sm:$0xf0] }
  0x3d   : > { %585 = vmatpush.bf16.msra.mxu1 %v1761_v12  ;;  %769 = vmatpush.bf16.msra.mxu3 %v1795_v48  ;;  %v1845_v12 = vld [vmem:[%s2619_s9 + $0xb0] sm:$0xf0] }
  0x3e   : > { %v1813_v48 = vld [vmem:[%s2618_s8 + $0x70] sm:$0xf0] }
  0x40   : > { %525 = vmatpush.bf16.msra.mxu0 %v1768_v13  ;;  %677 = vmatpush.bf16.msra.mxu2 %v1777_v38  ;;  %v1657_v13 = vld [vmem:[%s2618_s8 + $0xb0] sm:$0xf]  ;;  %v1601_v38 = vld [vmem:[%s2618_s8 + $0x48] sm:$0xf] }
  0x41   : > { %586 = vmatpush.bf16.msra.mxu1 %v1760_v14  ;;  %770 = vmatpush.bf16.msra.mxu3 %v1794_v50  ;;  %v1746_v14 = vor.u32 %v1845_v12, %v1745_v11  ;;  %v1589_v50 = vld [vmem:[%s2618_s8 + $0x30] sm:$0xf]  ;;  %v1565_v12 = vld [vmem:[%s2618_s8] sm:$0xf] }
  0x44   : > { %526 = vmatpush.bf16.msra.mxu0 %v1767_v15  ;;  %678 = vmatpush.bf16.msra.mxu2 %v1776_v39  ;;  %v1822_v15 = vld [vmem:[%s2618_s8 + $0xb8] sm:$0xf0]  ;;  %v1809_v39 = vld [vmem:[%s2618_s8 + $0x50] sm:$0xf0] }
  0x45   : > { %587 = vmatpush.bf16.msra.mxu1 %v1759_v16  ;;  %771 = vmatpush.bf16.msra.mxu3 %v1793_v52  ;;  %v1814_v16 = vld [vmem:[%s2618_s8 + $0x7c] sm:$0xf] }
  0x47   : > { %527 = vmatmul.bf16.vlgmr.msra.gmra.mxu0 %v2177_v18 }
  0x48   : > { %588 = vmatmul.bf16.vlgmr.msra.gmra.mxu1 %v2184_v19  ;;  %679 = vmatpush.bf16.msra.mxu2 %v1775_v40 }
  0x49   : > { %827 = vmatpush.bf16.msrb.mxu0 %v1790_v41  ;;  %772 = vmatpush.bf16.msra.mxu3 %v1792_v55  ;;  %v1618_v41 = vor.u32 %v1811_v31, %v1615_v32  ;;  %v1805_v55 = vld [vmem:[%s2618_s8 + $0x34] sm:$0xf]  ;;  %v1673_v32 = vld [vmem:[%s2619_s9 + $0x18] sm:$0xf] }
  0x4a   : > { %1012 = vmatpush.bf16.msrb.mxu1 %v1650_v0  ;;  %v1577_v0 = vld [vmem:[%s2618_s8 + $0x18] sm:$0xf] }
  0x4c   : > { %1025 = vmatpush.bf16.msrb.mxu2 %v1654_v4  ;;  %v1802_v4 = vld [vmem:[%s2618_s8 + $0x1c] sm:$0xf] }
  0x4d   : > { %828 = vmatpush.bf16.msrb.mxu0 %v1789_v43  ;;  %773 = vmatpush.bf16.msra.mxu3 %v1791_v60  ;;  %v1808_v43 = vld [vmem:[%s2618_s8 + $0x4c] sm:$0xf]  ;;  %v1810_v60 = vld [vmem:[%s2618_s8 + $0x58] sm:$0xf0] }
  0x4e   : > { %1013 = vmatpush.bf16.msrb.mxu1 %v1638_v6  ;;  %v1685_v6 = vld [vmem:[%s2619_s9 + $0x30] sm:$0xf] }
  0x50   : > { %1026 = vmatpush.bf16.msrb.mxu2 %v1642_v10  ;;  %v1578_v10 = vor.u32 %v1803_v1, %v1577_v0  ;;  %v1837_v0 = vld [vmem:[%s2619_s9 + $0x70] sm:$0xf0] }
  0x51   : > { %829 = vmatpush.bf16.msrb.mxu0 %v1788_v45  ;;  %v1836_v45 = vld [vmem:[%s2619_s9 + $0x68] sm:$0xf0]  ;;  %v1829_v1 = vld [vmem:[%s2619_s9 + $0x34] sm:$0xf] }
  0x52   : > { %v1710_v52 = vor.u32 %v1836_v45, %v1709_v44  ;;  %v1661_v44 = vld [vmem:[%s2619_s9] sm:$0xf]  ;;  %v1824_v45 = vld [vmem:[%s2619_s9 + $0x8] sm:$0xf0] }
  0x55   : > { %830 = vmatpush.bf16.msrb.mxu0 %v1787_v47  ;;  %v1621_v47 = vld [vmem:[%s2618_s8 + $0x68] sm:$0xf] }
  0x59   : > { %831 = vmatpush.bf16.msrb.mxu0 %v1786_v49  ;;  %v1602_v49 = vor.u32 %v1809_v39, %v1601_v38  ;;  %v1804_v38 = vld [vmem:[%s2618_s8 + $0x28] sm:$0xf0] }
  0x5d   : > { %832 = vmatpush.bf16.msrb.mxu0 %v1785_v51  ;;  %v1806_v51 = vld [vmem:[%s2618_s8 + $0x38] sm:$0xf0] }
  0x5e   : > { %v1590_v61 = vor.u32 %v1806_v51, %v1589_v50  ;;  %v1801_v50 = vld [vmem:[%s2618_s8 + $0x10] sm:$0xf0] }
  0x61   : > { %833 = vmatpush.bf16.msrb.mxu0 %v1784_v54  ;;  %v1622_v54 = vor.u32 %v1813_v48, %v1621_v47  ;;  %v1662_v47 = vor.u32 %v1824_v45, %v1661_v44  ;;  %v1843_v48 = vld [vmem:[%s2619_s9 + $0xa0] sm:$0xf0] }
  0x65   : > { %834 = vmatpush.bf16.msrb.mxu0 %v1783_v56  ;;  %v1697_v56 = vld [vmem:[%s2619_s9 + $0x48] sm:$0xf] }
  0x68   : > { %835 = vmatmul.bf16.vlgmr.msrb.gmra.mxu0 %v2184_v19  ;;  %v1627_v19 = vld [vmem:[%s2618_s8 + $0x84] sm:$0xf0] }
  0x69   : > { %1219 = vmatpush.bf16.msra.mxu0 %v1746_v14  ;;  %v1630_v28 = vor.u32 %v1814_v16, %v1627_v19  ;;  %v1582_v14 = vor.u32 %v1802_v4, %v1579_v5  ;;  %v1844_v19 = vld [vmem:[%s2619_s9 + $0xac] sm:$0xf]  ;;  %v1705_v4 = vld [vmem:[%s2619_s9 + $0x50] sm:$0xf]  ;;  %v1834_v5 = vld [vmem:[%s2619_s9 + $0x58] sm:$0xf0] }
  0x6b   : > { %1027 = vmatpush.bf16.msrb.mxu2 %v1630_v28 }
  0x6f   : > { %1028 = vmatpush.bf16.msrb.mxu2 %v1618_v41  ;;  %v1838_v41 = vld [vmem:[%s2619_s9 + $0x7c] sm:$0xf] }
  0xc4   : > { %v528_v20 = vpop.f32.mrf.mxu0 }
  0xc5   : > { %v589_v21 = vpop.f32.mrf.mxu1 }
  0xc6   : > { %v590_v23 = vadd.f32 %v589_v21, %v528_v20  ;;  %v1658_v20 = vor.u32 %v1822_v15, %v1657_v13  ;;  %v1733_v21 = vld [vmem:[%s2619_s9 + $0x90] sm:$0xf]  ;;  %v1800_v13 = vld [vmem:[%s2618_s8 + $0x8] sm:$0xf0] }
  0xc8   : > { %v594_v24 = vadd.f32 %v593_v22, %v590_v23  ;;  %v1626_v22 = vor.u32 %v1815_v8, %v1625_v7  ;;  %v1842_v23 = vld [vmem:[%s2619_s9 + $0x98] sm:$0xf0]  ;;  %1038 = vmatpush.bf16.msrb.mxu3 %v1658_v20  ;;  %v1597_v8 = vld [vmem:[%s2618_s8 + $0x38] sm:$0xf] }
  0xc9   : > { %v1734_v29 = vor.u32 %v1842_v23, %v1733_v21  ;;  %v1830_v7 = vld [vmem:[%s2619_s9 + $0x38] sm:$0xf0]  ;;  %v1747_v20 = vld [vmem:[%s2619_s9 + $0xb4] sm:$0xf0]  ;;  %v1598_v21 = vor.u32 %v1807_v9, %v1597_v8  ;;  %v1675_v8 = vld [vmem:[%s2619_s9 + $0x24] sm:$0xf0]  ;;  %v1706_v9 = vor.u32 %v1834_v5, %v1705_v4 }
  0xca   : > { %v596_v25 = vsel %vm595_vm0, %v594_v24, -inf  ;;  %1014 = vmatpush.bf16.msrb.mxu1 %v1626_v22  ;;  %v1686_v15 = vor.u32 %v1830_v7, %v1685_v6  ;;  %v1566_v22 = vor.u32 %v1800_v13, %v1565_v12  ;;  %v1826_v7 = vld [vmem:[%s2619_s9 + $0x1c] sm:$0xf]  ;;  %v1831_v12 = vld [vmem:[%s2619_s9 + $0x40] sm:$0xf0] }
  0xcb   : > { %597 = vmax.xlane.f32.xlu0 %v596_v25  ;;  %v1819_v25 = vld [vmem:[%s2618_s8 + $0xa0] sm:$0xf0]  ;;  %1220 = vmatpush.bf16.msra.mxu0 %v1734_v29 }
  0xcc   : > { %v530_v26 = vpop.f32.mrf.mxu0  ;;  %v1799_v29 = vld [vmem:[%s2618_s8 + $0x4] sm:$0xf] }
  0xcd   : > { %v591_v27 = vpop.f32.mrf.mxu1  ;;  %v1613_v26 = vld [vmem:[%s2618_s8 + $0x60] sm:$0xf]  ;;  %v1823_v13 = vld [vmem:[%s2619_s9 + $0x4] sm:$0xf] }
  0xce   : > { %v1812_v27 = vld [vmem:[%s2618_s8 + $0x68] sm:$0xf0] }
  0xe5   : > { %v2399_v62 = vpop.f32.mrf.mxu0 }
  0xed   : > { %v838_v23 = vpop.f32.mrf.mxu0 }
  0xee   : > { %v1825_v23 = vld [vmem:[%s2619_s9 + $0x10] sm:$0xf0] }
 0x13e   : > { %v598_v33 = vpop.xlane.xlu0 %597 }
 0x13f   : > { %v599_v34 = vsub.f32 %v594_v24, %v598_v33  ;;  %v1645_v24 = vld [vmem:[%s2618_s8 + $0x98] sm:$0xf] }
 0x140   : > { %v1646_v30 = vor.u32 %v1819_v25, %v1645_v24  ;;  %v1721_v33 = vld [vmem:[%s2619_s9 + $0x78] sm:$0xf]  ;;  %v1750_v24 = vor.u32 %v1844_v19, %v1747_v20  ;;  %v1841_v25 = vld [vmem:[%s2619_s9 + $0x94] sm:$0xf]  ;;  %v1681_v19 = vld [vmem:[%s2619_s9 + $0x20] sm:$0xf] }
 0x141   : > { %v600_v35 = vmul.f32 1.442695, %v599_v34  ;;  %v1839_v34 = vld [vmem:[%s2619_s9 + $0x80] sm:$0xf0]  ;;  %v1828_v20 = vld [vmem:[%s2619_s9 + $0x28] sm:$0xf0] }
 0x142   : > { %v1722_v40 = vor.u32 %v1839_v34, %v1721_v33  ;;  %1039 = vmatpush.bf16.msrb.mxu3 %v1646_v30  ;;  %v1567_v30 = vld [vmem:[%s2618_s8 + $0xc] sm:$0xf0]  ;;  %v1827_v33 = vld [vmem:[%s2619_s9 + $0x20] sm:$0xf0] }
 0x143   : > { %1887 = vpow2.f32 %v600_v35  ;;  %v1633_v35 = vld [vmem:[%s2618_s8 + $0x80] sm:$0xf]  ;;  %v1570_v31 = vor.u32 %v1799_v29, %v1567_v30  ;;  %v1753_v34 = vld [vmem:[%s2619_s9 + $0xb0] sm:$0xf] }
 0x144   : > { %1221 = vmatpush.bf16.msra.mxu0 %v1722_v40 }
 0x148   : > { %1222 = vmatpush.bf16.msra.mxu0 %v1710_v52 }
 0x149   : > { %v1888_v36 = vpop.eup %1887 }
 0x14a   : > { %v602_v37 = vsel %vm595_vm0, %v1888_v36, 0.0 }
 0x14b   : > { %603 = vadd.xlane.f32.xlu0 %v602_v37  ;;  %v1614_v37 = vor.u32 %v1812_v27, %v1613_v26  ;;  %v1735_v26 = vld [vmem:[%s2619_s9 + $0x9c] sm:$0xf0] }
 0x14c   : > { %v1738_v28 = vor.u32 %v1841_v25, %v1735_v26  ;;  %v840_v26 = vld [vmem:[%s2617_s7] sm:$0x1] }
 0x14d   : > { %1015 = vmatpush.bf16.msrb.mxu1 %v1614_v37  ;;  %v1585_v37 = vld [vmem:[%s2618_s8 + $0x20] sm:$0xf] }
 0x14e   : > { %v1586_v40 = vor.u32 %v1804_v38, %v1585_v37 }
 0x151   : > { %1016 = vmatpush.bf16.msrb.mxu1 %v1602_v49  ;;  %v1573_v49 = vld [vmem:[%s2618_s8 + $0x8] sm:$0xf] }
 0x152   : > { %v1574_v52 = vor.u32 %v1801_v50, %v1573_v49 }
 0x155   : > { %1017 = vmatpush.bf16.msrb.mxu1 %v1590_v61 }
 0x159   : > { %1018 = vmatpush.bf16.msrb.mxu1 %v1578_v10  ;;  %v1678_v10 = vor.u32 %v1826_v7, %v1675_v8 }
 0x15d   : > { %1019 = vmatpush.bf16.msrb.mxu1 %v1566_v22  ;;  %v1669_v22 = vld [vmem:[%s2619_s9 + $0x8] sm:$0xf] }
 0x161   : > { %1232 = vmatpush.bf16.msra.mxu1 %v1750_v24  ;;  %v1670_v24 = vor.u32 %v1825_v23, %v1669_v22 }
 0x165   : > { %1233 = vmatpush.bf16.msra.mxu1 %v1738_v28 }
 0x1be   : > { %v604_v53 = vpop.xlane.xlu0 %603 }
 0x1bf   : > { %1889 = vrcp.f32 %v604_v53  ;;  %v1606_v53 = vor.u32 %v1808_v43, %v1603_v46  ;;  %v1741_v46 = vld [vmem:[%s2619_s9 + $0x98] sm:$0xf] }
 0x1c0   : > { %v1742_v51 = vor.u32 %v1843_v48, %v1741_v46 }
 0x1c1   : > { %1029 = vmatpush.bf16.msrb.mxu2 %v1606_v53  ;;  %v1835_v53 = vld [vmem:[%s2619_s9 + $0x64] sm:$0xf] }
 0x1c5   : > { %v1890_v57 = vpop.eup %1889 }
 0x1c6   : > { %v606_v58 = vmul.f32 %v1890_v57, %v1888_v36  ;;  %v1816_v36 = vld [vmem:[%s2618_s8 + $0x88] sm:$0xf0]  ;;  %v1833_v57 = vld [vmem:[%s2619_s9 + $0x50] sm:$0xf0] }
 0x1c7   : > { %v1634_v42 = vor.u32 %v1816_v36, %v1633_v35  ;;  %v1698_v63 = vor.u32 %v1833_v57, %v1697_v56  ;;  %v1674_v35 = vor.u32 %v1827_v33, %v1673_v32  ;;  %v1846_v36 = vld [vmem:[%s2619_s9 + $0xb8] sm:$0xf0]  ;;  %v1729_v56 = vld [vmem:[%s2619_s9 + $0x80] sm:$0xf]  ;;  %v1840_v57 = vld [vmem:[%s2619_s9 + $0x88] sm:$0xf0] }
 0x1c8   : > { %v607_v59 = vpack.c.bf16 %v606_v58, %v606_v58  ;;  %1307 = vst [vmem:[%s2119_s20] sm:$0x1] %v606_v58  ;;  %v1591_v58 = vld [vmem:[%s2618_s8 + $0x3c] sm:$0xf0]  ;;  %v1754_v39 = vor.u32 %v1846_v36, %v1753_v34 }
 0x1c9   : > { %1040 = vmatpush.bf16.msrb.mxu3 %v1634_v42  ;;  %v1594_v2 = vor.u32 %v1805_v55, %v1591_v58  ;;  %1223 = vmatpush.bf16.msra.mxu0 %v1698_v63  ;;  %v1723_v42 = vld [vmem:[%s2619_s9 + $0x84] sm:$0xf0]  ;;  %v1730_v58 = vor.u32 %v1840_v57, %v1729_v56 }
 0x1ca   : > { %680 = vmatmul.bf16.vlgmr.msra.gmra.mxu2 %v607_v59  ;;  %v1609_v59 = vld [vmem:[%s2618_s8 + $0x50] sm:$0xf]  ;;  %v1726_v43 = vor.u32 %v1838_v41, %v1723_v42  ;;  %v1717_v63 = vld [vmem:[%s2619_s9 + $0x68] sm:$0xf] }
 0x1cb   : > { %v1610_v3 = vor.u32 %v1810_v60, %v1609_v59  ;;  %1030 = vmatpush.bf16.msrb.mxu2 %v1594_v2  ;;  %v1832_v59 = vld [vmem:[%s2619_s9 + $0x4c] sm:$0xf]  ;;  %v1699_v60 = vld [vmem:[%s2619_s9 + $0x54] sm:$0xf0]  ;;  %v1718_v2 = vor.u32 %v1837_v0, %v1717_v63 }
 0x1cc   : > { %1234 = vmatpush.bf16.msra.mxu1 %v1726_v43  ;;  %v1702_v61 = vor.u32 %v1832_v59, %v1699_v60 }
 0x1cd   : > { %1041 = vmatpush.bf16.msrb.mxu3 %v1622_v54  ;;  %1224 = vmatpush.bf16.msra.mxu0 %v1686_v15  ;;  %v1711_v54 = vld [vmem:[%s2619_s9 + $0x6c] sm:$0xf0] }
 0x1ce   : > { %v1714_v55 = vor.u32 %v1835_v53, %v1711_v54 }
 0x1cf   : > { %1031 = vmatpush.bf16.msrb.mxu2 %v1582_v14  ;;  %v1663_v14 = vld [vmem:[%s2619_s9 + $0xc] sm:$0xf0] }
 0x1d0   : > { %1235 = vmatpush.bf16.msra.mxu1 %v1714_v55 }
 0x1d1   : > { %1042 = vmatpush.bf16.msrb.mxu3 %v1610_v3  ;;  %1225 = vmatpush.bf16.msra.mxu0 %v1674_v35  ;;  %v1687_v3 = vld [vmem:[%s2619_s9 + $0x3c] sm:$0xf0] }
 0x1d2   : > { %v1690_v6 = vor.u32 %v1829_v1, %v1687_v3 }
 0x1d3   : > { %1032 = vmatpush.bf16.msrb.mxu2 %v1570_v31 }
 0x1d4   : > { %1236 = vmatpush.bf16.msra.mxu1 %v1702_v61 }
 0x1d5   : > { %1043 = vmatpush.bf16.msrb.mxu3 %v1598_v21  ;;  %1226 = vmatpush.bf16.msra.mxu0 %v1662_v47  ;;  %v1682_v21 = vor.u32 %v1828_v20, %v1681_v19 }
 0x1d7   : > { %1245 = vmatpush.bf16.msra.mxu2 %v1754_v39 }
 0x1d8   : > { %1227 = vmatmul.bf16.vlgmr.msra.gmra.mxu0 %v2177_v18  ;;  %1237 = vmatpush.bf16.msra.mxu1 %v1690_v6 }
 0x1d9   : > { %1044 = vmatpush.bf16.msrb.mxu3 %v1586_v40 }
 0x1db   : > { %1246 = vmatpush.bf16.msra.mxu2 %v1742_v51 }
 0x1dc   : > { %1238 = vmatpush.bf16.msra.mxu1 %v1678_v10 }
 0x1dd   : > { %1045 = vmatpush.bf16.msrb.mxu3 %v1574_v52 }
 0x1df   : > { %1247 = vmatpush.bf16.msra.mxu2 %v1730_v58 }
 0x1e3   : > { %1248 = vmatpush.bf16.msra.mxu2 %v1718_v2 }
 0x1e7   : > { %1249 = vmatpush.bf16.msra.mxu2 %v1706_v9 }
 0x24d   : > { %v681_v11 = vpop.f32.mrf.mxu2 }
 0x24e   : > { %v701_v16 = vpack.c.bf16 %v681_v11, %v681_v11  ;;  %v1693_v11 = vld [vmem:[%s2619_s9 + $0x38] sm:$0xf] }
 0x24f   : > { %v1694_v15 = vor.u32 %v1831_v12, %v1693_v11 }
 0x250   : > { %774 = vmatmul.bf16.vlgmr.msra.gmra.mxu3 %v701_v16  ;;  %v1666_v16 = vor.u32 %v1823_v13, %v1663_v14 }
 0x251   : > { %1250 = vmatpush.bf16.msra.mxu2 %v1694_v15 }
 0x252   : > { %1239 = vmatpush.bf16.msra.mxu1 %v1666_v16 }
 0x255   : > { %v683_v27 = vpop.f32.mrf.mxu2  ;;  %1251 = vmatpush.bf16.msra.mxu2 %v1682_v21 }
 0x259   : > { %1252 = vmatpush.bf16.msra.mxu2 %v1670_v24 }
 0x2d3   : > { %v775_v25 = vpop.f32.mrf.mxu3 }
 0x2d4   : > { %v837_v27 = vadd.f32 %v2399_v62, %v775_v25 }
 0x2d6   : > { %v841_v28 = vadd.f32 %v840_v26, %v837_v27 }
 0x2d8   : > { %v842_v29 = vmax.f32 %v841_v28, 0.0 }
 0x2da   : > { %v843_v30 = vpack.c.bf16 %v842_v29, %v842_v29 }
 0x2db   : > { %v777_v31 = vpop.f32.mrf.mxu3 }
 0x2dc   : > { %1020 = vmatmul.bf16.vlgmr.msrb.gmra.mxu1 %v843_v30  ;;  %1033 = vmatmul.bf16.vlgmr.msrb.gmra.mxu2 %v843_v30 }
 0x2dd   : > { %1046 = vmatmul.bf16.vlgmr.msrb.gmra.mxu3 %v843_v30 }
 0x2ec   : > { %1240 = vmatmul.bf16.vlgmr.msra.gmra.mxu1 %v2177_v18  ;;  %1253 = vmatmul.bf16.vlgmr.msra.gmra.mxu2 %v2177_v18 }
 0x2ed   : > { %1940 = shalt.err (!%p1937_p7)
}
 0x2ee   : > { %1847 = dma.vmem_to_hbm [thread:$0]  (%p2091_p5), %s1326_s19, 16, %s1328_s14, %s1312_s26   ;;  %v1228_v18 = vpop.f32.mrf.mxu0  ;;  %v1083_v32 = vld [vmem:[%s2621_s11] sm:$0x7] }
 0x2ef   : > { %v876_v33 = vld [vmem:[%s2620_s10] sm:$0x7]  ;;  %v1213_v34 = vperm.slane %v1083_v32, 0  ;;  %v1214_v46 = vperm.slane %v1083_v32, 1  ;;  %v1215_v63 = vperm.slane %v1083_v32, 2  ;;  %s2642_s19 = scalar_lea.vmem %s2622_s12, %s2105_s25 }
 0x2f0   : > { %v1006_v35 = vperm.slane %v876_v33, 0  ;;  %v1007_v45 = vperm.slane %v876_v33, 1  ;;  %v1008_v9 = vperm.slane %v876_v33, 2 }
 0x2f1   : > { %v1229_v36 = vadd.f32 %v1228_v18, %v1213_v34 }
 0x2f6   : > { %v1230_v62 = vpop.f32.mrf.mxu0 }
 0x359   : > { %v1021_v37 = vpop.f32.mrf.mxu1 }
 0x35a   : > { %v1022_v38 = vadd.f32 %v1021_v37, %v1006_v35 }
 0x35c   : > { %v1258_v39 = vadd.f32 %v1229_v36, %v1022_v38 }
 0x35e   : > { %v1755_v40 = vmul.f32 -1.442695, %v1258_v39 }
 0x35f   : > { %v1034_v41 = vpop.f32.mrf.mxu2 }
 0x360   : > { %1891 = vpow2.f32 %v1755_v40  ;;  %v1047_v42 = vpop.f32.mrf.mxu3  ;;  %v1035_v51 = vadd.f32 %v1034_v41, %v1007_v45 }
 0x361   : > { %v1023_v43 = vpop.f32.mrf.mxu1  ;;  %v1048_v12 = vadd.f32 %v1047_v42, %v1008_v9 }
 0x366   : > { %v1892_v44 = vpop.eup %1891 }
 0x367   : > { %v1262_v47 = vadd.f32 1.0, %v1892_v44  ;;  %v1036_v48 = vpop.f32.mrf.mxu2 }
 0x368   : > { %v1049_v49 = vpop.f32.mrf.mxu3 }
 0x369   : > { %1893 = vrcp.f32 %v1262_v47  ;;  %v1241_v50 = vpop.f32.mrf.mxu1  ;;  %v1274_v61 = vand.u32 2147483648, %v1262_v47  ;;  %v1272_v0 = vand.u32 2147483647, %v1262_v47  ;;  %vm1268_vm2 = vweird.f32 %v1262_v47 }
 0x36a   : > { %v1242_v52 = vadd.f32 %v1241_v50, %v1214_v46 }
 0x36b   : > { %v1275_v6 = vor.u32 1.1754944e-38, %v1274_v61  ;;  %vm1273_vm4 = vcmp.eq.f32.partialorder %v1272_v0, 8.507059e+37 }
 0x36c   : > { %v1278_v53 = vadd.f32 %v1242_v52, %v1035_v51 }
 0x36e   : > { %v1756_v54 = vmul.f32 -1.442695, %v1278_v53 }
 0x36f   : > { %v1894_v55 = vpop.eup %1893  ;;  %v1254_v56 = vpop.f32.mrf.mxu2 }
 0x370   : > { %1895 = vpow2.f32 %v1756_v54  ;;  %v1264_v57 = vmul.f32 %v1894_v55, %v1262_v47  ;;  %vm1269_vm1 = vweird.f32 %v1894_v55  ;;  %v1255_v7 = vadd.f32 %v1254_v56, %v1215_v63 }
 0x371   : > { %v1243_v58 = vpop.f32.mrf.mxu1  ;;  %vm1270_vm3 = vmor %vm1268_vm2, %vm1269_vm1 }
 0x372   : > { %v1265_v59 = vsub.f32 1.0, %v1264_v57 }
 0x374   : > { %v1266_v60 = vmul.f32 %v1894_v55, %v1265_v59 }
 0x376   : > { %v1896_v1 = vpop.eup %1895  ;;  %v1267_v2 = vadd.f32 %v1894_v55, %v1266_v60 }
 0x377   : > { %v1282_v3 = vadd.f32 1.0, %v1896_v1  ;;  %v1256_v4 = vpop.f32.mrf.mxu2 }
 0x378   : > { %v1271_v5 = vsel %vm1270_vm3, %v1894_v55, %v1267_v2 }
 0x379   : > { %1897 = vrcp.f32 %v1282_v3  ;;  %v1276_v8 = vsel %vm1273_vm4, %v1275_v6, %v1271_v5  ;;  %v1294_v16 = vand.u32 2147483648, %v1282_v3  ;;  %v1292_v20 = vand.u32 2147483647, %v1282_v3 }
 0x37a   : > { %v1298_v10 = vmul.f32 %v1276_v8, %v1255_v7  ;;  %vm1288_vm6 = vweird.f32 %v1282_v3 }
 0x37b   : > { %v1295_v22 = vor.u32 1.1754944e-38, %v1294_v16  ;;  %vm1293_vm8 = vcmp.eq.f32.partialorder %v1292_v20, 8.507059e+37 }
 0x37c   : > { %v1299_v14 = vadd.f32 %v1298_v10, %v1048_v12 }
 0x37e   : > { %1899 = vtanh.f32 %v1299_v14 }
 0x37f   : > { %v1898_v11 = vpop.eup %1897 }
 0x380   : > { %v1284_v13 = vmul.f32 %v1898_v11, %v1282_v3  ;;  %vm1289_vm5 = vweird.f32 %v1898_v11 }
 0x381   : > { %vm1290_vm7 = vmor %vm1288_vm6, %vm1289_vm5 }
 0x382   : > { %v1285_v15 = vsub.f32 1.0, %v1284_v13 }
 0x384   : > { %v1286_v19 = vmul.f32 %v1898_v11, %v1285_v15  ;;  %v1900_v26 = vpop.eup %1899 }
 0x386   : > { %v1287_v21 = vadd.f32 %v1898_v11, %v1286_v19 }
 0x388   : > { %v1291_v23 = vsel %vm1290_vm7, %v1898_v11, %v1287_v21 }
 0x389   : > { %v1296_v24 = vsel %vm1293_vm8, %v1295_v22, %v1291_v23 }
 0x38a   : > { %v1301_v25 = vsub.f32 1.0, %v1296_v24  ;;  %v1303_v28 = vmul.f32 %v1296_v24, %v2173_v17 }
 0x38c   : > { %v1302_v27 = vmul.f32 %v1900_v26, %v1301_v25 }
 0x38e   : > { %v1304_v29 = vadd.f32 %v1303_v28, %v1302_v27 }
 0x390   : > { %1305 = vst [vmem:[#allocation2] sm:$0x1] %v1304_v29 }
 0x391   : > { %1306 = vst [vmem:[%s2642_s19] sm:$0x1] %v1304_v29 }
 0x392 PF: > { %p1853_p5 = scmp.ge.s32.totalorder %s1977_s15, 2  ;;  %s1345_s17 = sand.u32 1, %s1965_s29  }
 0x393   : > { %s1346_s26 = scalar_lea.sflag [#allocation6], %s1345_s17 }
 0x394   : > { %p1850_p8 = pnand %p1853_p5, %p2095_p6 }
 0x396   : > { %p1851_p9 = pneg %p1850_p8 }
 0x398   : > { %1960 = dma.done.wait (%p1851_p9), %s1346_s26, 16  }
 0x399   : > { %1962 = vsyncadd (%p1851_p9), %s1346_s26, 4294967280  ;;  %s2644_s15 = sld [smem:[#allocation10_spill]]  ;;  %s2647_s29 = smov %s1969_s30 }
 0x39a   : > { %s2645_s27 = sld [smem:[#allocation9_spill]] }
 0x39b   : > { %s2646_s14 = sld [smem:[#allocation11_spill]] }
 0x39f   : > { %p32_p10 = scmp.ge.s32.totalorder %s2644_s15, 10  }
 0x3a0   : > { %s2648_s30 = smov %s2645_s27 }
 0x3a1   :  { %34 = sbr.rel (!%p32_p10) target bundleno = 10 (0xa), region = 115 }
 0x3a6   :  { %1351 = vsyncpa [#allocation6], 1 }
 0x3a7   :  { %1353 = vsyncpa [#allocation6 + $0x1], 1 }

</bundles_post_ra>
